<compile_context>
chip_gen: v7x
topology: tpu7x:2x2x1
jax: 0.10.0
libtpu: 0.0.40
codegen_flags: <defaults>
</compile_context>

<pallas_src>
import functools

import jax
import jax.numpy as jnp
from jax import lax
from jax.experimental import pallas as pl
from jax.experimental.pallas import tpu as pltpu


def _convblock_kernel(x_ref, w1_ref, b1_ref, w2_ref, b2_ref, o_ref, *,
                      kernel_size, pad, seq_len, b_tile):
    """One grid step = `b_tile` batch rows, full sequence.

    x_ref  : (b_tile, C_in, L + 2*pad)   compute dtype (e.g. bf16)
    w1_ref : (C_out, K*C_in)             compute dtype
    b1_ref : (C_out, 1)                  f32
    w2_ref : (C_out, K*C_out)            compute dtype
    b2_ref : (C_out, 1)                  f32
    o_ref  : (b_tile, C_out, L)          f32
    """
    k = kernel_size
    c_out = o_ref.shape[1]

    w1 = w1_ref[...]
    w2 = w2_ref[...]
    b1 = b1_ref[...]
    b2 = b2_ref[...]
    cdt = w1.dtype

    for b in range(b_tile):                      # small static unroll
        x = x_ref[b]                             # (C_in, L + 2p)

        # ---- conv1 (im2col -> single matmul) + bias + ReLU ------------
        xcol = jnp.concatenate(
            [x[:, t:t + seq_len] for t in range(k)], axis=0)   # (K*C_in, L)
        y1 = jnp.dot(w1, xcol, preferred_element_type=jnp.float32) + b1
        y1 = jnp.maximum(y1, 0.0)                # (C_out, L) f32

        # ---- conv2 (zero halo, im2col -> single matmul) + bias + ReLU --
        y1c = y1.astype(cdt)
        if pad > 0:
            halo = jnp.zeros((c_out, pad), cdt)
            y1p = jnp.concatenate([halo, y1c, halo], axis=1)   # (C_out, L + 2p)
        else:
            y1p = y1c
        ycol = jnp.concatenate(
            [y1p[:, t:t + seq_len] for t in range(k)], axis=0)  # (K*C_out, L)
        y2 = jnp.dot(w2, ycol, preferred_element_type=jnp.float32) + b2
        o_ref[b] = jnp.maximum(y2, 0.0).astype(o_ref.dtype)


def conv_block_pallas(x_ncl, w1, b1, w2, b2, kernel_size, *,
                      batch_tile=8, compute_dtype=jnp.bfloat16):
    """x_ncl: (N, C_in, L) float32 (PyTorch NCL convention).
    w1: (C_out, C_in, K), b1: (C_out,), w2: (C_out, C_out, K), b2: (C_out,).
    Returns (N, C_out, L) float32 matching ConvBlock.forward semantics."""
    n, c_in, seq_len = x_ncl.shape
    c_out = w1.shape[0]
    k = kernel_size
    assert k % 2 == 1, "padding='same' with stride 1 assumes odd kernel here"
    pad = k // 2
    l_pad = seq_len + 2 * pad
    itemsize = jnp.dtype(compute_dtype).itemsize

    # ---- batch tile selection -----------------------------------------
    b_tile = max(1, min(batch_tile, n))
    if n >= 2:
        # keep >= 2 grid steps so the (parallel) batch axis spans both v7x TCs
        b_tile = max(1, min(b_tile, pl.cdiv(n, 2)))

    def _pipeline_bytes(bt):
        x_blk = bt * c_in * l_pad * itemsize
        o_blk = bt * c_out * seq_len * 4
        w_blk = (c_out * k * c_in + c_out * k * c_out) * itemsize + 2 * c_out * 4
        return 2 * (x_blk + o_blk + w_blk)       # double-buffered

    vmem_budget = 24 * 1024 * 1024               # conservative (v7x: 64 MiB total)
    while b_tile > 1 and _pipeline_bytes(b_tile) > vmem_budget:
        b_tile = max(1, b_tile // 2)

    n_pad = pl.cdiv(n, b_tile) * b_tile
    if n_pad != n:
        x_ncl = jnp.pad(x_ncl, ((0, n_pad - n), (0, 0), (0, 0)))

    # ---- host-side layout prep (no data transposes of x) ---------------
    # zero-pad L for 'same' conv; cast matmul operands to compute dtype
    x_padded = jnp.pad(x_ncl, ((0, 0), (0, 0), (pad, pad))).astype(compute_dtype)
    # weights (C_out, C_in, K) -> (C_out, K*C_in) matching im2col row order
    w1_flat = jnp.transpose(w1, (0, 2, 1)).reshape(c_out, k * c_in).astype(compute_dtype)
    w2_flat = jnp.transpose(w2, (0, 2, 1)).reshape(c_out, k * c_out).astype(compute_dtype)
    b1_r = b1.reshape(c_out, 1).astype(jnp.float32)
    b2_r = b2.reshape(c_out, 1).astype(jnp.float32)

    kernel = functools.partial(_convblock_kernel, kernel_size=k, pad=pad,
                               seq_len=seq_len, b_tile=b_tile)

    vmem_limit = int(min(max(4 * _pipeline_bytes(b_tile), 16 * 1024 * 1024),
                         48 * 1024 * 1024))

    out = pl.pallas_call(
        kernel,
        out_shape=jax.ShapeDtypeStruct((n_pad, c_out, seq_len), jnp.float32),
        grid_spec=pltpu.PrefetchScalarGridSpec(
            num_scalar_prefetch=0,
            grid=(n_pad // b_tile,),
            in_specs=[
                pl.BlockSpec((b_tile, c_in, l_pad), lambda i: (i, 0, 0)),
                pl.BlockSpec((c_out, k * c_in), lambda i: (0, 0)),
                pl.BlockSpec((c_out, 1), lambda i: (0, 0)),
                pl.BlockSpec((c_out, k * c_out), lambda i: (0, 0)),
                pl.BlockSpec((c_out, 1), lambda i: (0, 0)),
            ],
            out_specs=pl.BlockSpec((b_tile, c_out, seq_len), lambda i: (i, 0, 0)),
        ),
        compiler_params=pltpu.CompilerParams(
            dimension_semantics=("parallel",),
            vmem_limit_bytes=vmem_limit),
    )(x_padded, w1_flat, b1_r, w2_flat, b2_r)

    if n_pad != n:
        out = out[:n]
    return out                                   # (N, C_out, L), NCL


# ------------------------- parameter init ------------------------------
def xavier_uniform_conv1d(key, c_out, c_in, k):
    # nn.init.xavier_uniform_ on Conv1d weight: fan_in = c_in*k, fan_out = c_out*k
    fan_in, fan_out = c_in * k, c_out * k
    bound = (6.0 / (fan_in + fan_out)) ** 0.5
    return jax.random.uniform(key, (c_out, c_in, k), jnp.float32, -bound, bound)


def conv1d_bias_default(key, c_out, c_in, k):
    # PyTorch Conv1d default bias init: U(-1/sqrt(fan_in), 1/sqrt(fan_in))
    bound = 1.0 / ((c_in * k) ** 0.5)
    return jax.random.uniform(key, (c_out,), jnp.float32, -bound, bound)


# ------------------------- reference (plain JAX) ------------------------
def conv_block_ref(x_ncl, w1, b1, w2, b2):
    def conv1d_same(x, w, b):
        y = lax.conv_general_dilated(
            x, w, window_strides=(1,), padding="SAME",
            dimension_numbers=("NCH", "OIH", "NCH"))
        return y + b[None, :, None]

    y = jnp.maximum(conv1d_same(x_ncl, w1, b1), 0.0)
    y = jnp.maximum(conv1d_same(y, w2, b2), 0.0)
    return y


if __name__ == "__main__":
    # Shapes consistent with ConvBlock(kernel_size=3, channels_in=4, channels_out=8)
    N, C_IN, C_OUT, L, K = 2, 4, 8, 16, 3

    key = jax.random.PRNGKey(0)
    kx, kw1, kb1, kw2, kb2 = jax.random.split(key, 5)

    x = jax.random.normal(kx, (N, C_IN, L), jnp.float32)
    w1 = xavier_uniform_conv1d(kw1, C_OUT, C_IN, K)
    b1 = conv1d_bias_default(kb1, C_OUT, C_IN, K)
    w2 = xavier_uniform_conv1d(kw2, C_OUT, C_OUT, K)
    b2 = conv1d_bias_default(kb2, C_OUT, C_OUT, K)

    ref = conv_block_ref(x, w1, b1, w2, b2)

    # f32 compute path (tight tolerance)
    out_f32 = conv_block_pallas(x, w1, b1, w2, b2, K, compute_dtype=jnp.float32)
    out_f32 = jax.block_until_ready(out_f32)
    assert out_f32.shape == (N, C_OUT, L)
    assert jnp.max(jnp.abs(out_f32 - ref)) < 1e-4

    # bf16-operand path (MXU-native on v6e/v7x; f32 accumulation) — relaxed tol
    out_bf16 = conv_block_pallas(x, w1, b1, w2, b2, K, compute_dtype=jnp.bfloat16)
    out_bf16 = jax.block_until_ready(out_bf16)
    assert out_bf16.shape == (N, C_OUT, L)
    assert jnp.max(jnp.abs(out_bf16 - ref)) < 5e-2

    print("KERNEL_OK")
</pallas_src>

<mosaic_0001>
module attributes {stable_mosaic.version = 11 : i64} {
  func.func @_convblock_kernel(%arg0: i32, %arg1: memref<1x4x18xf32, #tpu.memory_space<vmem>>, %arg2: memref<8x12xf32, #tpu.memory_space<vmem>>, %arg3: memref<8x1xf32, #tpu.memory_space<vmem>>, %arg4: memref<8x24xf32, #tpu.memory_space<vmem>>, %arg5: memref<8x1xf32, #tpu.memory_space<vmem>>, %arg6: memref<1x8x16xf32, #tpu.memory_space<vmem>>) attributes {dimension_semantics = [#tpu.dimension_semantics<parallel>], iteration_bounds = array<i64: 2>, scalar_prefetch = 0 : i64, scratch_operands = 0 : i64, tpu.core_type = #tpu.core_type<tc>, window_params = [{transform_indices = @transform_0, window_bounds = array<i64: 1, 4, 18>}, {pipeline_mode = #tpu.pipeline_mode<synchronous>, transform_indices = @transform_1, window_bounds = array<i64: 8, 12>}, {pipeline_mode = #tpu.pipeline_mode<synchronous>, transform_indices = @transform_2, window_bounds = array<i64: 8, 1>}, {pipeline_mode = #tpu.pipeline_mode<synchronous>, transform_indices = @transform_3, window_bounds = array<i64: 8, 24>}, {pipeline_mode = #tpu.pipeline_mode<synchronous>, transform_indices = @transform_4, window_bounds = array<i64: 8, 1>}, {transform_indices = @transform_5, window_bounds = array<i64: 1, 8, 16>}]} {
    %c0 = arith.constant 0 : index
    %c0_0 = arith.constant 0 : index
    %0 = vector.load %arg2[%c0, %c0_0] : memref<8x12xf32, #tpu.memory_space<vmem>>, vector<8x12xf32>
    %c0_1 = arith.constant 0 : index
    %c0_2 = arith.constant 0 : index
    %1 = vector.load %arg4[%c0_1, %c0_2] : memref<8x24xf32, #tpu.memory_space<vmem>>, vector<8x24xf32>
    %c0_3 = arith.constant 0 : index
    %c0_4 = arith.constant 0 : index
    %2 = vector.load %arg3[%c0_3, %c0_4] : memref<8x1xf32, #tpu.memory_space<vmem>>, vector<8x1xf32>
    %c0_5 = arith.constant 0 : index
    %c0_6 = arith.constant 0 : index
    %3 = vector.load %arg5[%c0_5, %c0_6] : memref<8x1xf32, #tpu.memory_space<vmem>>, vector<8x1xf32>
    %c0_7 = arith.constant 0 : index
    %c0_8 = arith.constant 0 : index
    %c0_9 = arith.constant 0 : index
    %4 = vector.load %arg1[%c0_7, %c0_8, %c0_9] : memref<1x4x18xf32, #tpu.memory_space<vmem>>, vector<1x4x18xf32>
    %5 = vector.shape_cast %4 : vector<1x4x18xf32> to vector<4x18xf32>
    %6 = vector.extract_strided_slice %5 {offsets = [0, 0], sizes = [4, 16], strides = [1, 1]} : vector<4x18xf32> to vector<4x16xf32>
    %7 = vector.extract_strided_slice %5 {offsets = [0, 1], sizes = [4, 16], strides = [1, 1]} : vector<4x18xf32> to vector<4x16xf32>
    %8 = vector.extract_strided_slice %5 {offsets = [0, 2], sizes = [4, 16], strides = [1, 1]} : vector<4x18xf32> to vector<4x16xf32>
    %9 = tpu.concatenate %6, %7, %8 in 0 : vector<4x16xf32>, vector<4x16xf32>, vector<4x16xf32> -> vector<12x16xf32>
    %cst = arith.constant dense<0.000000e+00> : vector<8x16xf32>
    %10 = tpu.matmul %0, %9, %cst {dimension_numbers = #tpu.dot_dimension_numbers<[1], [0], [0], [1], [0, 0, 1, 1], [], []>} : vector<8x12xf32>, vector<12x16xf32>, vector<8x16xf32> -> vector<8x16xf32>
    %11 = vector.broadcast %2 : vector<8x1xf32> to vector<8x16xf32>
    %12 = arith.addf %10, %11 : vector<8x16xf32>
    %cst_10 = arith.constant 0.000000e+00 : f32
    %13 = vector.broadcast %cst_10 : f32 to vector<8x16xf32>
    %14 = arith.maximumf %12, %13 : vector<8x16xf32>
    %cst_11 = arith.constant 0.000000e+00 : f32
    %15 = vector.broadcast %cst_11 : f32 to vector<8x1xf32>
    %16 = tpu.concatenate %15, %14, %15 in 1 : vector<8x1xf32>, vector<8x16xf32>, vector<8x1xf32> -> vector<8x18xf32>
    %17 = vector.extract_strided_slice %16 {offsets = [0, 0], sizes = [8, 16], strides = [1, 1]} : vector<8x18xf32> to vector<8x16xf32>
    %18 = vector.extract_strided_slice %16 {offsets = [0, 1], sizes = [8, 16], strides = [1, 1]} : vector<8x18xf32> to vector<8x16xf32>
    %19 = vector.extract_strided_slice %16 {offsets = [0, 2], sizes = [8, 16], strides = [1, 1]} : vector<8x18xf32> to vector<8x16xf32>
    %20 = tpu.concatenate %17, %18, %19 in 0 : vector<8x16xf32>, vector<8x16xf32>, vector<8x16xf32> -> vector<24x16xf32>
    %cst_12 = arith.constant dense<0.000000e+00> : vector<8x16xf32>
    %21 = tpu.matmul %1, %20, %cst_12 {dimension_numbers = #tpu.dot_dimension_numbers<[1], [0], [0], [1], [0, 0, 1, 1], [], []>} : vector<8x24xf32>, vector<24x16xf32>, vector<8x16xf32> -> vector<8x16xf32>
    %22 = vector.broadcast %3 : vector<8x1xf32> to vector<8x16xf32>
    %23 = arith.addf %21, %22 : vector<8x16xf32>
    %cst_13 = arith.constant 0.000000e+00 : f32
    %24 = vector.broadcast %cst_13 : f32 to vector<8x16xf32>
    %25 = arith.maximumf %23, %24 : vector<8x16xf32>
    %c0_14 = arith.constant 0 : index
    %c0_15 = arith.constant 0 : index
    %c0_16 = arith.constant 0 : index
    %26 = vector.load %arg6[%c0_14, %c0_15, %c0_16] : memref<1x8x16xf32, #tpu.memory_space<vmem>>, vector<1x8x16xf32>
    %27 = vector.shape_cast %26 : vector<1x8x16xf32> to vector<8x16xf32>
    %28 = vector.shape_cast %25 : vector<8x16xf32> to vector<1x8x16xf32>
    tpu.vector_store %arg6[%c0_14, %c0_15, %c0_16], %28 {strides = array<i32>} : memref<1x8x16xf32, #tpu.memory_space<vmem>>, vector<1x8x16xf32>,
    return
  }
  func.func @transform_0(%arg0: i32) -> (i32, i32, i32) {
    %c0_i32 = arith.constant 0 : i32
    %c0_i32_0 = arith.constant 0 : i32
    %c0_i32_1 = arith.constant 0 : i32
    return %arg0, %c0_i32, %c0_i32_0 : i32, i32, i32
  }
  func.func @transform_1(%arg0: i32) -> (i32, i32) {
    %c0_i32 = arith.constant 0 : i32
    %c0_i32_0 = arith.constant 0 : i32
    %c0_i32_1 = arith.constant 0 : i32
    return %c0_i32, %c0_i32_0 : i32, i32
  }
  func.func @transform_2(%arg0: i32) -> (i32, i32) {
    %c0_i32 = arith.constant 0 : i32
    %c0_i32_0 = arith.constant 0 : i32
    %c0_i32_1 = arith.constant 0 : i32
    return %c0_i32, %c0_i32_0 : i32, i32
  }
  func.func @transform_3(%arg0: i32) -> (i32, i32) {
    %c0_i32 = arith.constant 0 : i32
    %c0_i32_0 = arith.constant 0 : i32
    %c0_i32_1 = arith.constant 0 : i32
    return %c0_i32, %c0_i32_0 : i32, i32
  }
  func.func @transform_4(%arg0: i32) -> (i32, i32) {
    %c0_i32 = arith.constant 0 : i32
    %c0_i32_0 = arith.constant 0 : i32
    %c0_i32_1 = arith.constant 0 : i32
    return %c0_i32, %c0_i32_0 : i32, i32
  }
  func.func @transform_5(%arg0: i32) -> (i32, i32, i32) {
    %c0_i32 = arith.constant 0 : i32
    %c0_i32_0 = arith.constant 0 : i32
    %c0_i32_1 = arith.constant 0 : i32
    return %arg0, %c0_i32, %c0_i32_0 : i32, i32, i32
  }
}

</mosaic_0001>

<bundles_post_ra>
// kernel: tpu_custom_call.1
= control target key start
LH: loop header
LB: loop body
LE: loop exit
PB: predicated region body
PF: predicated region fallthrough
CT: control target
= control target key end

     0   :  { %10 = vsyncpa [#allocation3], 0  ;;  %s797_s0 = inlined_call_operand.vmem [shape: f32[2,4,18], index: 0, kind: input, shape index: {}]   ;;  %s798_s1 = inlined_call_operand.vmem [shape: f32[8,12], index: 1, kind: input, shape index: {}]   ;;  %s799_s2 = inlined_call_operand.vmem [shape: f32[8,1], index: 2, kind: input, shape index: {}]   ;;  %s800_s3 = inlined_call_operand.vmem [shape: f32[8,24], index: 3, kind: input, shape index: {}]   ;;  %s801_s4 = inlined_call_operand.vmem [shape: f32[8,1], index: 4, kind: input, shape index: {}]   ;;  %s802_s5 = inlined_call_operand.hbm [shape: f32[2,8,16], index: 5, kind: output, shape index: {}]  }
   0x1   :  { %12 = vsyncpa [#allocation3 + $0x1], 0  ;;  %s683_s18 = smov 0   ;;  %s685_s19 = smov 0  }
   0x2   :  { %s687_s20 = smov 0   ;;  %s689_s21 = smov 0  }
   0x3 LB: > { %s704_s22 = sadd.s32 4294967295, %s642_s21   ;;  %s486_s23 = sadd.s32 4294967294, %s642_s21   ;;  %s642_s21 = sphi %s689_s21, %s808_s21   ;;  %s638_s20 = sphi %s687_s20, %s807_s20   ;;  %s634_s19 = sphi %s685_s19, %s806_s19   ;;  %s630_s18 = sphi %s683_s18, %s805_s18  }
   0x4   : > { %s708_s24 = sadd.s32 1, %s642_s21   ;;  %s135_s25 = sadd.s32 1, %s638_s20 }
   0x5   : > { %s132_s26 = ssub.s32 %s642_s21, %s708_s24  ;;  %p145_p0 = scmp.ne.s32.totalorder %s638_s20, %s634_s19 }
   0x6   : > { %p133_p1 = scmp.eq.s32.totalorder %s132_s26, 0  ;;  %p146_p2 = scmp.eq.s32.totalorder %s704_s22, 1 }
   0x7   : > { %p151_p3 = scmp.ne.s32.totalorder %s634_s19, %s630_s18  ;;  %p152_p4 = scmp.eq.s32.totalorder %s486_s23, 1 }
   0x8   : > { %s719_s27 = scalar_select %p133_p1, %s638_s20, %s135_s25  }
   0x9   : > { %p721_p5 = por %p146_p2, %p145_p0  ;;  %p725_p6 = por %p152_p4, %p151_p3 }
   0xa   : > { %p489_p7 = scmp.ge.s32.totalorder %s642_s21, 1  ;;  %p189_p8 = scmp.lt.s32.totalorder %s642_s21, 3 }
   0xc   : > { %p190_p9 = pnand %p489_p7, %p189_p8 }
   0xd   : > { %p216_p10 = scmp.lt.s32.totalorder (!%p190_p9), %s704_s22, 1  ;;  %v644_v0 = vmov (!%p190_p9), 0.0|0.0   ;;  %vm645_vm0 = vmmov (!%p190_p9), 0   ;;  %v646_v1 = vmov (!%p190_p9), 0.0   ;;  %v222_v2 = vld [vmem:[%s799_s2] sm:$0xff] (!%p190_p9)  ;;  %v647_v4 = vmov (!%p190_p9), 0  }
   0xe   : > { %193 = sbr.rel (%p190_p9) target bundleno = 837 (0x345), region = 40  ;;  %523 = vmatprep.subr.bf16.mxu0 (!%p190_p9), %v644_v0  ;;  %527 = vmatprep.subr.bf16.mxu1 (!%p190_p9), %v644_v0  ;;  %s648_s12 = smov (!%p190_p9), 127   ;;  %vm232_vm1 = vcmask (!%p190_p9), 1043456   ;;  %vm650_vm2 = vmmov (!%p190_p9), 1   ;;  %v220_v10 = vld [vmem:[%s798_s1] sm:$0xff] (!%p190_p9)  ;;  %vm239_vm4 = vcmask (!%p190_p9), 97280  }
   0xf   : > { %511 = vmatprep.mubr.msk.f32.mxu0 (!%p190_p9), %vm645_vm0, %v646_v1  ;;  %520 = vmatprep.mubr.msk.f32.mxu1 (!%p190_p9), %vm645_vm0, %v646_v1  ;;  %s649_s13 = smov (!%p190_p9), 126   ;;  %vm525_vm3 = vmpackc.low (!%p190_p9), %vm232_vm1, %vm650_vm2  ;;  %s651_s16 = smov (!%p190_p9), 1   ;;  %vm320_vm5 = vcmask (!%p190_p9), 7168   ;;  %vm322_vm6 = vcmask (!%p190_p9), 138240   ;;  %v223_v19 = vld [vmem:[%s801_s4] sm:$0xff] (!%p190_p9)  ;;  %vm336_vm8 = vcmask (!%p190_p9), 195584  }
  0x10   : > { %578 = vset.pattern.permute.xlu1 (!%p190_p9), %v647_v4  ;;  %579 = vset.pattern.permute.xlu0 (!%p190_p9), %v647_v4  ;;  %vm529_vm7 = vmpackc.low (!%p190_p9), %vm650_vm2, %vm322_vm6  ;;  %v221_v22 = vld [vmem:[%s800_s3] sm:$0xff] (!%p190_p9)  ;;  %s497_s7 = sshll.u32 (!%p190_p9), %s704_s22, 7  ;;  %vm411_vm9 = vcmask (!%p190_p9), 130048  }
  0x11   : > { %236 = vperm.xlu1 (!%p190_p9), %578, %v222_v2  }
  0x15   : > { %s217_s30 = scalar_select %p216_p10, %s704_s22, 1 }
  0x16   : > { %s652_s22 = smov [#allocation2]  }
  0x17   : > { %s491_s6 = sshll.u32 %s217_s30, 2  ;;  %s213_s30 = sand.u32 1, %s634_s19  }
  0x18   : > { %s219_s9 = scalar_lea.vmem %s797_s0, %s491_s6  ;;  %s490_s6 = sshll.u32 %s213_s30, 3 }
  0x19   : > { %v224_v3 = vld [vmem:[%s219_s9] sm:$0xf]  ;;  %s215_s8 = scalar_lea.vmem [#allocation2], %s490_s6  ;;  %s584_s15 = sshll.u32 %s652_s22, 4  ;;  %s585_s15 = int_to_ptr.vmem [resolvable:$false] %s584_s15 }
  0x1a   : > { %v226_v5 = vrot.slane %v224_v3, 4  ;;  %s427_s9 = sshll.u32 %s215_s8, 4  ;;  %s757_s9 = int_to_ptr.vmem [resolvable:$true] %s427_s9 }
  0x1b   : > { %s580_s14 = scalar_lea.vmem %s757_s9, 128  ;;  %p587_p0 = scmp.lt.s32.totalorder %s757_s9, %s585_s15 }
  0x1c   : > { %227 = vrot.lane.b32.xlu0 %v226_v5, %s648_s12  ;;  %p581_p11 = scmp.ne.s32.totalorder %s757_s9, %s580_s14 }
  0x1e   : > { %p582_p12 = pnand %p581_p11, %p721_p5 }
  0x20   : > { %230 = vrot.lane.b32.xlu0 %v224_v3, %s649_s13  ;;  %p583_p13 = pneg %p582_p12 }
  0x8e   : > { %v228_v6 = vpop.permute.xlu0 %227 }
  0x8f   : > { %v233_v7 = vsel %vm232_vm1, %v224_v3, %v228_v6 }
  0x90   : > { %v237_v11 = vpop.permute.xlu1 %236 }
  0x92   : > { %v231_v8 = vpop.permute.xlu0 %230 }
  0x93   : > { %v524_v9 = vpack.c.bf16 %v231_v8, %v233_v7 }
  0x95   : > { %526 = vmatpush3.bf16.msk.msra.mxu0 %vm525_vm3, %v524_v9 }
  0x98   : > { %512 = vmatmul.mubr.msk.f32.vlgmr.msra.gmra.mrb[0].mxu0 %vm239_vm4, %v220_v10 }
 0x16b   : > { %v311_v12 = vpop.f32.mrb[0].mxu0 }
 0x16c   : > { %v312_v13 = vadd.f32 %v311_v12, %v237_v11  ;;  %v513_v14 = vpop.f32.mrb[1].mxu0 }
 0x16e   : > { %v315_v15 = vmax.f32 %v312_v13, 0.0 }
 0x170   : > { %317 = vrot.lane.b32.xlu1 %v315_v15, %s651_s16  ;;  %s586_s16 = scalar_lea.vmem %s585_s15, 256 }
 0x171   : > { %p588_p1 = scmp.lt.s32.totalorder %s586_s16, %s580_s14 }
 0x173   : > { %p589_p2 = por %p588_p1, %p587_p0 }
 0x175   : > { %p590_p3 = pnand %p589_p2, %p583_p13 }
 0x1e2   : > { %v318_v16 = vpop.permute.xlu1 %317 }
 0x1e3   : > { %v321_v17 = vsel %vm320_vm5, 0.0, %v318_v16 }
 0x1e4   : > { %v323_v18 = vsel %vm322_vm6, %v321_v17, 0.0 }
 0x1e5   : > { %328 = vrot.lane.b32.xlu1 %v323_v18, %s649_s13  ;;  %325 = vrot.lane.b32.xlu0 %v323_v18, %s648_s12  ;;  %s755_s12 = scalar_lea.hbm %s802_s5, %s497_s7  ;;  %s414_s13 = scalar_lea.sflag [#allocation3], %s213_s30 }
 0x1e9   : > { %333 = vperm.xlu0 %579, %v223_v19  }
 0x257   : > { %v326_v20 = vpop.permute.xlu0 %325  ;;  %v329_v23 = vpop.permute.xlu1 %328 }
 0x258   : > { %v528_v21 = vpack.c.bf16 %v326_v20, %v321_v17 }
 0x25a   : > { %530 = vmatpush3.bf16.msk.msra.mxu1 %vm529_vm7, %v528_v21 }
 0x25b   : > { %518 = vmatprep.subr.mxu1 %v646_v1 }
 0x25e   : > { %519 = vmatpush3.msra.mxu1 %v329_v23 }
 0x25f   : > { %521 = vmatmul.mubr.msk.f32.vlgmr.msra.gmra.mrb[0].mxu1 %vm336_vm8, %v221_v22 }
 0x268   : > { %v334_v24 = vpop.permute.xlu0 %333 }
 0x332   : > { %v406_v25 = vpop.f32.mrb[0].mxu1 }
 0x333   : > { %v407_v26 = vadd.f32 %v406_v25, %v334_v24  ;;  %v522_v27 = vpop.f32.mrb[1].mxu1 }
 0x335   : > { %v410_v28 = vmax.f32 %v407_v26, 0.0 }
 0x337   : > { %412 = vst.msk [vmem:[%s215_s8] sm:$0xff] %vm411_vm9, %v410_v28 }
 0x338   : > { %593 = shalt.err (!%p590_p3)
}
 0x339   : > { %s594_s17 = scalar_lea.hbm %s755_s12, 128  ;;  %s598_s26 = scalar_lea.hbm %s802_s5, 256 }
 0x33a   : > { %p595_p4 = scmp.ne.s32.totalorder %s755_s12, %s594_s17  ;;  %p599_p9 = scmp.lt.u32.totalorder %s755_s12, %s802_s5 }
 0x33b   : > { %p600_p10 = scmp.lt.u32.totalorder %s598_s26, %s594_s17  ;;  %p602_p12 = scmp.lt.u32.totalorder %s594_s17, %s755_s12 }
 0x33c   : > { %p596_p7 = pnand %p595_p4, %p721_p5 }
 0x33d   : > { %p601_p11 = por %p600_p10, %p599_p9 }
 0x33e   : > { %p597_p8 = pneg %p596_p7 }
 0x33f   : > { %p603_p13 = por %p602_p12, %p601_p11 }
 0x341   : > { %p604_p0 = pnand %p603_p13, %p597_p8 }
 0x343   : > { %607 = shalt.err (!%p604_p0)
}
 0x344   : > { %531 = dma.vmem_to_hbm [thread:$0]  (%p721_p5), %s757_s9, 128, %s755_s12, %s414_s13  }
 0x345 PF: > { %p537_p1 = scmp.ge.s32.totalorder %s642_s21, 2  ;;  %s439_s7 = sand.u32 1, %s630_s18  }
 0x346   : > { %s440_s8 = scalar_lea.sflag [#allocation3], %s439_s7 }
 0x347   : > { %p534_p2 = pnand %p537_p1, %p725_p6 }
 0x349   : > { %625 = dma.done.wait (!%p534_p2), %s440_s8, 128  }
 0x34a   : > { %627 = vsyncadd (!%p534_p2), %s440_s8, 4294967168  ;;  %p15_p3 = scmp.ge.s32.totalorder %s708_s24, 4   ;;  %s805_s18 = smov %s634_s19 }
 0x34b   : > { %s806_s19 = smov %s638_s20  ;;  %s807_s20 = smov %s719_s27 }
 0x34c   : > { %s808_s21 = smov %s708_s24  ;;  %17 = sbr.rel (!%p15_p3) target bundleno = 3 (0x3), region = 75 }
 0x353   :  { %445 = vsyncpa [#allocation3], 1 }
 0x354   :  { %447 = vsyncpa [#allocation3 + $0x1], 1 }

</bundles_post_ra>
